<compile_context>
chip_gen: v7x
topology: tpu7x:2x2x1
jax: 0.10.0
libtpu: 0.0.40
codegen_flags: <defaults>
</compile_context>

<pallas_src>
import math

import jax
import jax.numpy as jnp
from jax.experimental import pallas as pl
from jax.experimental.pallas import tpu as pltpu

NEG_SLOPE = 0.01  # nn.LeakyReLU() default negative_slope

# Input bytes we are willing to keep fully resident for the single-shot
# (ungridded) path.  Kept below v5e's 16 MiB scoped-VMEM default so the
# ungridded path is always safe on every generation (v6e: 32 MiB, v7x: 32 MiB
# scoped / 64 MiB physical).
_UNGRIDDED_VMEM_BUDGET = 12 << 20


def _leaky_relu(z):
    # max(z, 0.01*z): one vmul + one vmax instead of compare+select.
    return jnp.maximum(z, NEG_SLOPE * z)


def predictor_kernel(nb_ref, w1_ref, b1_ref, w2_ref, b2_ref,
                     w3_ref, b3_ref, w4_ref, b4_ref, o_ref):
    """Fused 4-layer MLP; output stored lane-dense as (F, tb).

    nb_ref: (tb, D) activations; w*_ref: (in, out); b*_ref: (1, out);
    o_ref:  (F, tb) with the batch on the LANE axis (a (tb, 1) column output
    would lower to per-lane masked stores; the in-kernel transpose rides the
    otherwise-idle XLU slot).
    """
    x = nb_ref[...]
    x = _leaky_relu(
        jnp.dot(x, w1_ref[...], preferred_element_type=jnp.float32) + b1_ref[...])
    x = _leaky_relu(
        jnp.dot(x, w2_ref[...], preferred_element_type=jnp.float32) + b2_ref[...])
    x = _leaky_relu(
        jnp.dot(x, w3_ref[...], preferred_element_type=jnp.float32) + b3_ref[...])
    logits = jnp.dot(x, w4_ref[...], preferred_element_type=jnp.float32) + b4_ref[...]
    # Sigmoid: exp goes to the EUP slot; exact reciprocal keeps f32 parity.
    # exp(-x) -> inf for very negative logits gives reciprocal(inf)=0: the
    # correct limit, no NaN.
    sig = pl.reciprocal(1.0 + jnp.exp(-logits))      # (tb, F)
    o_ref[...] = jnp.transpose(sig)                  # (F, tb), lane-dense store


def init_predictor_params(key, reach):
    """Deterministic init mirroring Predictor.__init__ shapes.

    Weights stored pre-transposed as (in_features, out_features), biases as
    (1, out_features).  Returns (list of 24 8-tuples, C)."""
    nnb = reach * (reach + 1) * 2
    C = nnb * 3 + 1
    params = []
    for idx in range(24):
        dims = [(C + (idx >> 3), C // 2),
                (C // 2, C // 4),
                (C // 4, C // 4),
                (C // 4, 1)]
        layer = []
        for fin, fout in dims:
            key, kw, kb = jax.random.split(key, 3)
            bound = 1.0 / math.sqrt(fin)              # nn.Linear default bounds
            w = jax.random.uniform(kw, (fin, fout), jnp.float32, -bound, bound)
            b = jax.random.uniform(kb, (1, fout), jnp.float32, -bound, bound)
            layer += [w, b]
        params.append(tuple(layer))
    return params, C


def _auto_batch_block(B):
    """Large tiles (>=512 rows) and preferably an EVEN tile count so a v7x
    chip splits the 'parallel' batch axis evenly across its two TensorCores."""
    for blk in (8192, 4096, 2048, 1024, 512):
        if B % blk == 0 and B // blk >= 2 and (B // blk) % 2 == 0:
            return blk
    for blk in (8192, 4096, 2048, 1024, 512):
        if B % blk == 0 and B // blk >= 2:
            return blk
    return None


def _predictor_apply(weights, nb, *, batch_block=None):
    """Run the fused MLP defined by `weights` on nb (B, D); returns (F, B)."""
    w1, b1, w2, b2, w3, b3, w4, b4 = weights
    B, D = nb.shape
    F = w4.shape[1]                      # out features of the last layer
    nb_bytes = B * D * 4

    block = None
    if batch_block is not None:
        # Explicit request: honor it only if it is a legal tiling.
        if (B % batch_block == 0 and batch_block % 128 == 0
                and B // batch_block >= 2):
            block = batch_block
    elif nb_bytes > _UNGRIDDED_VMEM_BUDGET:
        block = _auto_batch_block(B)

    if block is None:
        # Single-shot path: everything resident in VMEM, zero grid overhead.
        vmem = pl.BlockSpec(memory_space=pltpu.MemorySpace.VMEM)
        need = nb_bytes + F * B * 4 + (256 << 10)     # input + output + weights
        cp = None
        if need > (12 << 20):
            # Only for huge ragged batches that could not be tiled; cap at the
            # v7x physical VMEM ceiling (64 MiB).
            cp = pltpu.CompilerParams(
                vmem_limit_bytes=min(need + (4 << 20), 64 << 20))
        return pl.pallas_call(
            predictor_kernel,
            out_shape=jax.ShapeDtypeStruct((F, B), jnp.float32),
            in_specs=[vmem] * 9,
            out_specs=vmem,
            compiler_params=cp,
        )(nb, *weights)

    # Gridded path (only for very large batches): batch axis "parallel".
    return pl.pallas_call(
        predictor_kernel,
        out_shape=jax.ShapeDtypeStruct((F, B), jnp.float32),
        grid=(B // block,),
        in_specs=[pl.BlockSpec((block, D), lambda i: (i, 0))]
                 + [pl.BlockSpec(p.shape, lambda i: (0, 0)) for p in weights],
        out_specs=pl.BlockSpec((F, block), lambda i: (0, i)),
        compiler_params=pltpu.CompilerParams(
            dimension_semantics=("parallel",)),
    )(nb, *weights)


def predictor_forward(layer_params, nb, workidx, *, batch_block=None):
    """Equivalent of Predictor.forward(nb, workidx); workidx is a Python int.

    nb must be float32 of shape (B, in_dim).  Default (batch_block=None):
    ungridded whenever nb fits the VMEM budget, else auto-tiled with >=512-row
    blocks and an even tile count.  Pass batch_block (a multiple of 128 that
    divides B) to force the gridded path."""
    out = _predictor_apply(layer_params[workidx], nb, batch_block=batch_block)
    return jnp.squeeze(out)              # (1, B) -> (B,)  (torch .squeeze())


def fuse_group(layer_params, indices):
    """Fuse G nets sharing an input dim (same idx >> 3 group) into a single
    block-diagonal MLP evaluated by ONE ungridded kernel call.

    W1 is concatenated along out-features, W2/W3/W4 are block-diagonal, so
    hidden activations become (B, G*18)/(B, G*9) (lanes filled) and the
    output is (G, B).  Built once at setup time with plain JAX."""
    nets = [layer_params[i] for i in indices]
    in_dim = nets[0][0].shape[0]
    assert all(n[0].shape[0] == in_dim for n in nets), \
        "fuse_group: all nets must share the same input dimension"
    w1 = jnp.concatenate([n[0] for n in nets], axis=1)
    b1 = jnp.concatenate([n[1] for n in nets], axis=1)
    w2 = jax.scipy.linalg.block_diag(*[n[2] for n in nets])
    b2 = jnp.concatenate([n[3] for n in nets], axis=1)
    w3 = jax.scipy.linalg.block_diag(*[n[4] for n in nets])
    b3 = jnp.concatenate([n[5] for n in nets], axis=1)
    w4 = jax.scipy.linalg.block_diag(*[n[6] for n in nets])
    b4 = jnp.concatenate([n[7] for n in nets], axis=1)
    return (w1, b1, w2, b2, w3, b3, w4, b4)


def predictor_forward_group(fused_params, nb, *, batch_block=None):
    """Evaluate a fuse_group() bundle of G nets on nb in ONE pallas_call.
    Returns (G, B) sigmoid outputs."""
    return _predictor_apply(fused_params, nb, batch_block=batch_block)


def _reference_forward(layer_params, nb, workidx):
    hp = jax.lax.Precision.HIGHEST
    w1, b1, w2, b2, w3, b3, w4, b4 = layer_params[workidx]
    x = _leaky_relu(jnp.dot(nb, w1, precision=hp) + b1)
    x = _leaky_relu(jnp.dot(x, w2, precision=hp) + b2)
    x = _leaky_relu(jnp.dot(x, w3, precision=hp) + b3)
    z = jnp.dot(x, w4, precision=hp) + b4
    return jnp.squeeze(1.0 / (1.0 + jnp.exp(-z)))


if __name__ == "__main__":
    key = jax.random.PRNGKey(0)
    reach = 2                          # nnb = 12, C = 37 -> dims 37+g / 18 / 9 / 9 / 1
    kp, kx1, kx2, kx3 = jax.random.split(key, 4)
    params, C = init_predictor_params(kp, reach)

    workidx = 10                       # idx >> 3 == 1 -> input dim = C + 1 = 38
    in_dim = C + (workidx >> 3)

    # 1) tiny batch, single net: ungridded all-in-VMEM path.
    nb_small = jax.random.normal(kx1, (8, in_dim), jnp.float32)
    out_small = jax.block_until_ready(predictor_forward(params, nb_small, workidx))
    ref_small = _reference_forward(params, nb_small, workidx)
    assert out_small.shape == (8,), out_small.shape
    assert jnp.allclose(out_small, ref_small, atol=1e-4, rtol=1e-4)

    # 2) moderate batch: the VMEM heuristic keeps this on the single-shot path
    #    (2048*38*4 B ~ 0.3 MiB << budget) -- no grid overhead on v5e/v6e.
    nb_mid = jax.random.normal(kx2, (2048, in_dim), jnp.float32)
    out_mid = jax.block_until_ready(predictor_forward(params, nb_mid, workidx))
    ref_mid = _reference_forward(params, nb_mid, workidx)
    assert out_mid.shape == (2048,), out_mid.shape
    assert jnp.allclose(out_mid, ref_mid, atol=1e-4, rtol=1e-4)

    # 3) force the gridded path (as used for huge batches): 512-row tiles,
    #    grid=(4,) -- even tile count, batch axis "parallel" for v7x's 2 TCs.
    out_grid = jax.block_until_ready(
        predictor_forward(params, nb_mid, workidx, batch_block=512))
    assert out_grid.shape == (2048,), out_grid.shape
    assert jnp.allclose(out_grid, ref_mid, atol=1e-4, rtol=1e-4)

    # 4) 8 nets sharing an input dim fused into ONE ungridded kernel call
    #    (block-diagonal weights; lane-packed activations; (G, B) output).
    grp_idx = list(range(8, 16))       # all have input dim C + 1
    fused = fuse_group(params, grp_idx)
    nb_grp = jax.random.normal(kx3, (64, in_dim), jnp.float32)
    out_grp = jax.block_until_ready(predictor_forward_group(fused, nb_grp))
    assert out_grp.shape == (8, 64), out_grp.shape
    for j, widx in enumerate(grp_idx):
        ref_j = _reference_forward(params, nb_grp, widx)
        assert jnp.allclose(out_grp[j], ref_j, atol=1e-4, rtol=1e-4)

    print("KERNEL_OK")
</pallas_src>

<mosaic_0001>
module attributes {stable_mosaic.version = 11 : i64} {
  func.func @predictor_kernel(%arg0: memref<8x38xf32, #tpu.memory_space<vmem>>, %arg1: memref<38x18xf32, #tpu.memory_space<vmem>>, %arg2: memref<1x18xf32, #tpu.memory_space<vmem>>, %arg3: memref<18x9xf32, #tpu.memory_space<vmem>>, %arg4: memref<1x9xf32, #tpu.memory_space<vmem>>, %arg5: memref<9x9xf32, #tpu.memory_space<vmem>>, %arg6: memref<1x9xf32, #tpu.memory_space<vmem>>, %arg7: memref<9x1xf32, #tpu.memory_space<vmem>>, %arg8: memref<1x1xf32, #tpu.memory_space<vmem>>, %arg9: memref<1x8xf32, #tpu.memory_space<vmem>>) attributes {dimension_semantics = [], scalar_prefetch = 0 : i64, scratch_operands = 0 : i64, tpu.core_type = #tpu.core_type<tc>} {
    %c0 = arith.constant 0 : index
    %c0_0 = arith.constant 0 : index
    %0 = vector.load %arg0[%c0, %c0_0] : memref<8x38xf32, #tpu.memory_space<vmem>>, vector<8x38xf32>
    %c0_1 = arith.constant 0 : index
    %c0_2 = arith.constant 0 : index
    %1 = vector.load %arg1[%c0_1, %c0_2] : memref<38x18xf32, #tpu.memory_space<vmem>>, vector<38x18xf32>
    %cst = arith.constant dense<0.000000e+00> : vector<8x18xf32>
    %2 = tpu.matmul %0, %1, %cst {dimension_numbers = #tpu.dot_dimension_numbers<[1], [0], [0], [1], [0, 0, 1, 1], [], []>} : vector<8x38xf32>, vector<38x18xf32>, vector<8x18xf32> -> vector<8x18xf32>
    %c0_3 = arith.constant 0 : index
    %c0_4 = arith.constant 0 : index
    %3 = vector.load %arg2[%c0_3, %c0_4] : memref<1x18xf32, #tpu.memory_space<vmem>>, vector<1x18xf32>
    %4 = vector.broadcast %3 : vector<1x18xf32> to vector<8x18xf32>
    %5 = arith.addf %2, %4 : vector<8x18xf32>
    %cst_5 = arith.constant 0.00999999977 : f32
    %6 = vector.broadcast %cst_5 : f32 to vector<8x18xf32>
    %7 = arith.mulf %6, %5 : vector<8x18xf32>
    %8 = arith.maximumf %5, %7 : vector<8x18xf32>
    %c0_6 = arith.constant 0 : index
    %c0_7 = arith.constant 0 : index
    %9 = vector.load %arg3[%c0_6, %c0_7] : memref<18x9xf32, #tpu.memory_space<vmem>>, vector<18x9xf32>
    %cst_8 = arith.constant dense<0.000000e+00> : vector<8x9xf32>
    %10 = tpu.matmul %8, %9, %cst_8 {dimension_numbers = #tpu.dot_dimension_numbers<[1], [0], [0], [1], [0, 0, 1, 1], [], []>} : vector<8x18xf32>, vector<18x9xf32>, vector<8x9xf32> -> vector<8x9xf32>
    %c0_9 = arith.constant 0 : index
    %c0_10 = arith.constant 0 : index
    %11 = vector.load %arg4[%c0_9, %c0_10] : memref<1x9xf32, #tpu.memory_space<vmem>>, vector<1x9xf32>
    %12 = vector.broadcast %11 : vector<1x9xf32> to vector<8x9xf32>
    %13 = arith.addf %10, %12 : vector<8x9xf32>
    %cst_11 = arith.constant 0.00999999977 : f32
    %14 = vector.broadcast %cst_11 : f32 to vector<8x9xf32>
    %15 = arith.mulf %14, %13 : vector<8x9xf32>
    %16 = arith.maximumf %13, %15 : vector<8x9xf32>
    %c0_12 = arith.constant 0 : index
    %c0_13 = arith.constant 0 : index
    %17 = vector.load %arg5[%c0_12, %c0_13] : memref<9x9xf32, #tpu.memory_space<vmem>>, vector<9x9xf32>
    %cst_14 = arith.constant dense<0.000000e+00> : vector<8x9xf32>
    %18 = tpu.matmul %16, %17, %cst_14 {dimension_numbers = #tpu.dot_dimension_numbers<[1], [0], [0], [1], [0, 0, 1, 1], [], []>} : vector<8x9xf32>, vector<9x9xf32>, vector<8x9xf32> -> vector<8x9xf32>
    %c0_15 = arith.constant 0 : index
    %c0_16 = arith.constant 0 : index
    %19 = vector.load %arg6[%c0_15, %c0_16] : memref<1x9xf32, #tpu.memory_space<vmem>>, vector<1x9xf32>
    %20 = vector.broadcast %19 : vector<1x9xf32> to vector<8x9xf32>
    %21 = arith.addf %18, %20 : vector<8x9xf32>
    %cst_17 = arith.constant 0.00999999977 : f32
    %22 = vector.broadcast %cst_17 : f32 to vector<8x9xf32>
    %23 = arith.mulf %22, %21 : vector<8x9xf32>
    %24 = arith.maximumf %21, %23 : vector<8x9xf32>
    %c0_18 = arith.constant 0 : index
    %c0_19 = arith.constant 0 : index
    %25 = vector.load %arg7[%c0_18, %c0_19] : memref<9x1xf32, #tpu.memory_space<vmem>>, vector<9x1xf32>
    %cst_20 = arith.constant dense<0.000000e+00> : vector<8x1xf32>
    %26 = tpu.matmul %24, %25, %cst_20 {dimension_numbers = #tpu.dot_dimension_numbers<[1], [0], [0], [1], [0, 0, 1, 1], [], []>} : vector<8x9xf32>, vector<9x1xf32>, vector<8x1xf32> -> vector<8x1xf32>
    %c0_21 = arith.constant 0 : index
    %c0_22 = arith.constant 0 : index
    %27 = vector.load %arg8[%c0_21, %c0_22] : memref<1x1xf32, #tpu.memory_space<vmem>>, vector<1x1xf32>
    %28 = vector.broadcast %27 : vector<1x1xf32> to vector<8x1xf32>
    %29 = arith.addf %26, %28 : vector<8x1xf32>
    %cst_23 = arith.constant 0.000000e+00 : f32
    %30 = vector.broadcast %cst_23 : f32 to vector<8x1xf32>
    %31 = arith.subf %30, %29 : vector<8x1xf32>
    %32 = math.exp %31 : vector<8x1xf32>
    %cst_24 = arith.constant 1.000000e+00 : f32
    %33 = vector.broadcast %cst_24 : f32 to vector<8x1xf32>
    %34 = arith.addf %33, %32 : vector<8x1xf32>
    %35 = tpu.reciprocal %34 : vector<8x1xf32> -> vector<8x1xf32>
    %36 = tpu.transpose %35, [1, 0] : vector<8x1xf32> -> vector<1x8xf32>
    %c0_25 = arith.constant 0 : index
    %c0_26 = arith.constant 0 : index
    %37 = vector.load %arg9[%c0_25, %c0_26] : memref<1x8xf32, #tpu.memory_space<vmem>>, vector<1x8xf32>
    tpu.vector_store %arg9[%c0_25, %c0_26], %36 {strides = array<i32>} : memref<1x8xf32, #tpu.memory_space<vmem>>, vector<1x8xf32>,
    return
  }
}

</mosaic_0001>

<bundles_post_ra>
// kernel: tpu_custom_call.1
= control target key start
LH: loop header
LB: loop body
LE: loop exit
PB: predicated region body
PF: predicated region fallthrough
CT: control target
= control target key end

     0   :  { %s681_s0 = inlined_call_operand.vmem [shape: f32[8,38], index: 0, kind: input, shape index: {}]   ;;  %s682_s1 = inlined_call_operand.vmem [shape: f32[38,18], index: 1, kind: input, shape index: {}]   ;;  %s683_s2 = inlined_call_operand.vmem [shape: f32[1,18], index: 2, kind: input, shape index: {}]   ;;  %s684_s3 = inlined_call_operand.vmem [shape: f32[18,9], index: 3, kind: input, shape index: {}]   ;;  %s685_s4 = inlined_call_operand.vmem [shape: f32[1,9], index: 4, kind: input, shape index: {}]   ;;  %s686_s5 = inlined_call_operand.vmem [shape: f32[9,9], index: 5, kind: input, shape index: {}]   ;;  %s687_s6 = inlined_call_operand.vmem [shape: f32[1,9], index: 6, kind: input, shape index: {}]   ;;  %s688_s7 = inlined_call_operand.vmem [shape: f32[9,1], index: 7, kind: input, shape index: {}]   ;;  %s689_s8 = inlined_call_operand.<no memory space> [shape: f32[1,1], index: 8, kind: input, shape index: {}]   ;;  %s690_s9 = inlined_call_operand.hbm [shape: f32[1,8], index: 9, kind: output, shape index: {}]  }
   0x1   :  { %v14_v0 = vstv %s689_s8 }
   0x2   :  { %15 = vst [vmem:[#allocation2] sm:$0x1] %v14_v0 }
   0x3   :  { %v36_v1 = vld [vmem:[%s682_s1] sm:$0xff]  ;;  %v37_v2 = vld [vmem:[%s682_s1 + $0x8] sm:$0xff]  ;;  %v38_v3 = vld [vmem:[%s682_s1 + $0x10] sm:$0xff]  ;;  %v559_v4 = vmov 0.0|0.0   ;;  %vm560_vm0 = vmmov 0   ;;  %v561_v7 = vmov 0.0  }
   0x4   :  { %509 = vmatprep.subr.bf16.mxu0 %v559_v4  ;;  %v510_v5 = vpack.c.bf16 %v37_v2, %v36_v1  ;;  %v39_v6 = vld [vmem:[%s682_s1 + $0x18] sm:$0xff]  ;;  %515 = vmatprep.subr.bf16.mxu1 %v559_v4 }
   0x5   :  { %483 = vmatprep.mubr.msk.f32.mxu0 %vm560_vm0, %v561_v7  ;;  %492 = vmatprep.mubr.msk.f32.mxu1 %vm560_vm0, %v561_v7 }
   0x6   :  { %16 = vsyncpa [#allocation4], 0  ;;  %511 = vmatpush3.bf16.msra.mxu0 %v510_v5  ;;  %v513_v8 = vpack.c.bf16 %v39_v6, %v38_v3  ;;  %v40_v9 = vld [vmem:[%s682_s1 + $0x20] sm:$0x3f]  ;;  %vm52_vm1 = vcmask 1045504   ;;  %vm48_vm2 = vcmask 310272  }
   0x7   :  { %512 = vmatprep.subr.bf16.mxu0 %v559_v4  ;;  %v35_v10 = vld [vmem:[%s681_s0] sm:$0xff]  ;;  %v129_v12 = vld [vmem:[%s684_s3 + $0x8] sm:$0xff]  ;;  %v130_v14 = vld [vmem:[%s684_s3 + $0x10] sm:$0x3]  ;;  %vm142_vm3 = vcmask 1041408   ;;  %vm138_vm4 = vcmask 146432  }
   0x8   :  { %v128_v11 = vld [vmem:[%s684_s3] sm:$0xff]  ;;  %v219_v22 = vld [vmem:[%s686_s5 + $0x8] sm:$0x1]  ;;  %vm231_vm5 = vcmask 1040384   ;;  %vm562_vm6 = vmmov 1   ;;  %vm227_vm8 = vcmask 72704  }
   0x9   :  { %v516_v13 = vpack.c.bf16 %v129_v12, %v128_v11  ;;  %v445_v15 = vld [vmem:[%s683_s2] ss:$0 sm:$0xff]  ;;  %vm520_vm7 = vmpackc.low %vm231_vm5, %vm562_vm6  ;;  %v308_v31 = vld [vmem:[%s688_s7 + $0x8] sm:$0x1]  ;;  %vm429_vm9 = vcmask 57344  }
   0xa   :  { %514 = vmatpush3.bf16.msra.mxu0 %v513_v8  ;;  %v218_v21 = vld [vmem:[%s686_s5] sm:$0xff] }
   0xb   :  { %481 = vmatprep.subr.mxu0 %v561_v7  ;;  %517 = vmatpush3.bf16.msra.mxu1 %v516_v13  ;;  %v519_v23 = vpack.c.bf16 %v219_v22, %v218_v21  ;;  %v448_v24 = vld [vmem:[%s685_s4] ss:$0 sm:$0xff]  ;;  %s563_s4 = smov [#allocation3]  }
   0xc   :  { %490 = vmatprep.subr.mxu1 %v561_v7  ;;  %v307_v30 = vld [vmem:[%s688_s7] sm:$0xff] }
   0xd   :  { %v523_v32 = vpack.c.bf16 %v308_v31, %v307_v30  ;;  %v451_v33 = vld [vmem:[%s687_s6] ss:$0 sm:$0xff]  ;;  %s437_s6 = sshll.u32 %s563_s4, 4  ;;  %s438_s6 = int_to_ptr.vmem [resolvable:$true] %s437_s6 }
   0xe   :  { %482 = vmatpush3.msk.msra.mxu0 %vm52_vm1, %v40_v9  ;;  %v454_v39 = vld [vmem:[#allocation2] ss:$0 sm:$0xff]  ;;  %s535_s7 = scalar_lea.vmem %s438_s6, 16  ;;  %s539_s16 = scalar_lea.vmem %s438_s6, 32 }
   0xf   :  { %484 = vmatmul.mubr.msk.f32.vlgmr.msra.gmra.mrb[0].mxu0 %vm48_vm2, %v35_v10  ;;  %522 = vmatprep.subr.bf16.mxu0 %v559_v4  ;;  %p536_p0 = scmp.ne.s32.totalorder %s438_s6, %s535_s7  ;;  %p540_p1 = scmp.lt.s32.totalorder %s438_s6, %s438_s6 }
  0x10   :  { %506 = vmatprep.mubr.msk.f32.mxu0 %vm560_vm0, %v561_v7  ;;  %491 = vmatpush3.msk.msra.mxu1 %vm142_vm3, %v130_v14  ;;  %p541_p2 = scmp.lt.s32.totalorder %s539_s16, %s535_s7 }
  0x11   :  { %518 = vmatprep.subr.bf16.mxu1 %v559_v4  ;;  %525 = vmatpush3.bf16.msk.msra.mxu0 %vm520_vm7, %v523_v32 }
  0x12   :  { %p542_p3 = por %p541_p2, %p540_p1 }
  0x14   :  { %p543_p4 = pnand %p542_p3, %p536_p0 }
  0xe2   :  { %v122_v16 = vpop.f32.mrb[0].mxu0 }
  0xe3   :  { %v123_v17 = vadd.f32 %v445_v15, %v122_v16  ;;  %v485_v18 = vpop.f32.mrb[1].mxu0 }
  0xe5   :  { %v126_v19 = vmul.f32 0.01, %v123_v17 }
  0xe7   :  { %v127_v20 = vmax.f32 %v123_v17, %v126_v19 }
  0xe9   :  { %493 = vmatmul.mubr.msk.f32.vlgmr.msra.gmra.mrb[0].mxu1 %vm138_vm4, %v127_v20 }
  0xea   :  { %499 = vmatprep.mubr.msk.f32.mxu1 %vm560_vm0, %v561_v7  ;;  %521 = vmatpush3.bf16.msk.msra.mxu1 %vm520_vm7, %v519_v23 }
 0x1bc   :  { %v212_v25 = vpop.f32.mrb[0].mxu1 }
 0x1bd   :  { %v213_v26 = vadd.f32 %v448_v24, %v212_v25  ;;  %v494_v27 = vpop.f32.mrb[1].mxu1 }
 0x1bf   :  { %v216_v28 = vmul.f32 0.01, %v213_v26 }
 0x1c1   :  { %v217_v29 = vmax.f32 %v213_v26, %v216_v28 }
 0x1c3   :  { %500 = vmatmul.mubr.msk.f32.vlgmr.msra.gmra.mrb[2].mxu1 %vm227_vm8, %v217_v29 }
 0x296   :  { %v301_v34 = vpop.f32.mrb[2].mxu1 }
 0x297   :  { %v302_v35 = vadd.f32 %v451_v33, %v301_v34  ;;  %v501_v36 = vpop.f32.mrb[3].mxu1 }
 0x299   :  { %v305_v37 = vmul.f32 0.01, %v302_v35 }
 0x29b   :  { %v306_v38 = vmax.f32 %v302_v35, %v305_v37 }
 0x29d   :  { %507 = vmatmul.mubr.msk.f32.vlgmr.msra.gmra.mrb[2].mxu0 %vm227_vm8, %v306_v38 }
 0x370   :  { %v388_v40 = vpop.f32.mrb[2].mxu0 }
 0x371   :  { %v389_v41 = vadd.f32 %v454_v39, %v388_v40  ;;  %v508_v42 = vpop.f32.mrb[3].mxu0 }
 0x373   :  { %v392_v43 = vsub.f32 0.0, %v389_v41 }
 0x375   :  { %v393_v44 = vmul.f32 1.442695, %v392_v43 }
 0x377   :  { %531 = vpow2.f32 %v393_v44 }
 0x381   :  { %v532_v45 = vpop.eup %531 }
 0x382   :  { %v395_v46 = vadd.f32 1.0, %v532_v45 }
 0x384   :  { %533 = vrcp.f32 %v395_v46 }
 0x38e   :  { %v534_v47 = vpop.eup %533 }
 0x38f   :  { %397 = vxpose.xlu0.b32.start.end [1/1] (short) (narrow) %v534_v47, 8 }
 0x40f   :  { %v413_v48 = vpop.trf.xlu0 }
 0x410   :  { %430 = vst.msk [vmem:[#allocation3] sm:$0x1] %vm429_vm9, %v413_v48 }
 0x411   :  { %546 = shalt.err (!%p543_p4)
}
 0x412   :  { %s547_s8 = scalar_lea.hbm %s690_s9, 16 }
 0x413   :  { %p548_p5 = scmp.ne.s32.totalorder %s690_s9, %s547_s8  ;;  %p551_p6 = scmp.lt.u32.totalorder %s547_s8, %s690_s9 }
 0x415   :  { %p553_p7 = pnand %p551_p6, %p548_p5 }
 0x417   :  { %556 = shalt.err (!%p553_p7)
}
 0x418   :  { %440 = dma.vmem_to_hbm [thread:$0]  %s438_s6, 16, %s690_s9, [#allocation4]  }
 0x419   :  { %557 = dma.done.wait [#allocation4], 16  }
 0x41a   :  { %558 = vsyncadd [#allocation4], 4294967280 }
 0x41b   :  { %444 = vsyncpa [#allocation4], 1 }

</bundles_post_ra>
